<compile_context>
chip_gen: v7x
topology: tpu7x:2x2x1
jax: 0.10.0
libtpu: 0.0.40
codegen_flags: <defaults>
</compile_context>

<pallas_src>
import functools
import math

import jax
import jax.numpy as jnp
from jax import lax
from jax.experimental import pallas as pl
from jax.experimental.pallas import tpu as pltpu

READ = 0
WRITE = 1

# Small, TPU-friendly sizes.
NUM_MODELS = 2      # ensemble size M (stacked block-diagonally in-kernel)
VOCAB = 128         # V (lane aligned)
EMBED = 32          # E
HIDDEN = 128        # H
SRC_LEN = 16        # S
LANES = 128

BOS, PAD, EOS, UNK = 0, 1, 2, 3   # fairseq dictionary convention


class TgtDict:
    def __len__(self): return VOCAB
    def pad(self): return PAD
    def unk(self): return UNK
    def eos(self): return EOS
    def bos(self): return BOS


# ----------------------------------------------------------------------------
# Fused generation kernel: encoder + the whole greedy read/write token loop.
#
# Per token step (inside a lax.fori_loop, skipped via pl.when once finished):
#   x      = enc_slab + emb_tgt_slab[last_token]              (S, 4E)
#   h      = relu(x @ W1_bd + b1)                             (S, 2H)  N=256
#   pooled = cummax over source positions (row c-1 <-> ctx=c) (S, 2H)
#   wp     = sigmoid(pooled[:, :H] . wd0 + bd0)   -- decide(), model 0
#   ctx'   = first ctx >= ctx with wp > threshold, else src_len+1 (batched scan)
#   logits = pooled @ W2_bd + b2, pick row min(ctx', S)-1      (1, 2V)  N=256
#   avg    = logaddexp(log_softmax0, log_softmax1) - log M ; mask nan/pad/unk
#   emit row `step` of the meta output: [token, score, context, valid]
#   state  : ctx' -> VMEM, token -> SMEM, done = (token == eos) -> SMEM
# ----------------------------------------------------------------------------
def _generate_kernel(src_ref, wenc_ref, benc_ref, embt_ref,
                     w1_ref, b1_ref, w2_ref, b2_ref, wd_ref, bd_ref,
                     out_ref, state_ref, ctx_ref, tokbuf_ref,
                     *, shift, threshold, t_max, max_read_len, src_len,
                     eos, pad, unk):
    S = src_len
    H, V = HIDDEN, VOCAB
    H2 = 2 * H

    # ---------------- one-time init (single grid step) ----------------
    out_ref[...] = jnp.zeros_like(out_ref)
    state_ref[0] = jnp.int32(eos)                 # last target token (BOS == EOS)
    state_ref[1] = jnp.int32(0)                   # done flag
    ctx_ref[...] = jnp.full((1, 1), shift, jnp.int32)

    # ---------------- encoder: both models, one bf16 MXU pass ----------
    enc = jnp.dot(src_ref[...].astype(jnp.bfloat16), wenc_ref[...],
                  preferred_element_type=jnp.float32)
    enc = jnp.maximum(enc + benc_ref[...], 0.0)   # (S, 4E) slab [0|enc0|0|enc1]

    # hoisted iotas (loop-invariant; JAX does not CSE broadcast_in_dim)
    rows_i = lax.broadcasted_iota(jnp.int32, (S, 1), 0)       # row r <-> ctx r+1
    row_sub = lax.broadcasted_iota(jnp.int32, (S, H2), 0)
    lane_v = lax.broadcasted_iota(jnp.int32, (1, V), 1)
    lane_o = lax.broadcasted_iota(jnp.int32, (1, LANES), 1)

    def token_step(step, carry):
        done = state_ref[1]

        @pl.when(done == 0)
        def _():
            tok = state_ref[0]
            ctx_v = ctx_ref[...]                              # (1, 1) int32

            # target-embedding row gather (scalar index -> dynamic row slice)
            tgt_row = embt_ref[pl.ds(tok, 1), :]              # (1, 4E)
            x = enc + tgt_row                                 # (S, 4E)

            # hidden layer, both models stacked along N = 2H = 256
            h = jnp.dot(x.astype(jnp.bfloat16), w1_ref[...],
                        preferred_element_type=jnp.float32)
            h = jnp.maximum(h + b1_ref[...], 0.0)             # (S, 2H)

            # cumulative max over source positions (row c-1 == pool for ctx=c):
            # log-step doubling via XLU sublane roll (no concat/pad copies).
            # -inf sentinel is safe under max (h >= 0 post-ReLU not required).
            m = h
            off = 1
            while off < S:
                rolled = pltpu.roll(m, shift=off, axis=0)
                m = jnp.maximum(m, jnp.where(row_sub < off, -jnp.inf, rolled))
                off *= 2
            pooled = m                                        # (S, 2H)

            # decide(): P(write) for every candidate ctx (model-0 head)
            wl = (jnp.sum(pooled[:, :H] * wd_ref[...], axis=-1, keepdims=True)
                  + bd_ref[0, 0])
            wp = jax.nn.sigmoid(wl)                           # (S, 1)

            # batched READ/WRITE scan: first ctx >= current ctx whose
            # P(write) > threshold, else src_len + 1 (forced write)
            cand_ctx = rows_i + 1
            eligible = (cand_ctx >= ctx_v) & (wp > threshold)
            cand_f = jnp.where(eligible, cand_ctx.astype(jnp.float32),
                               jnp.float32(max_read_len))
            first_w = jnp.min(cand_f, axis=0, keepdims=True)  # (1, 1)
            new_ctx_f = jnp.maximum(first_w, ctx_v.astype(jnp.float32))
            row_sel = jnp.minimum(new_ctx_f, jnp.float32(S)) - 1.0
            sel_mask = rows_i.astype(jnp.float32) == row_sel  # (S, 1)

            # output projection (both models, N = 2V = 256); pick the ctx row
            logits = jnp.dot(pooled.astype(jnp.bfloat16), w2_ref[...],
                             preferred_element_type=jnp.float32) + b2_ref[...]
            lrow = jnp.sum(jnp.where(sel_mask, logits, 0.0),
                           axis=0, keepdims=True)             # (1, 2V)
            lg0 = lrow[:, :V]
            lg1 = lrow[:, V:]

            def _log_softmax(z):
                mx = jnp.max(z, axis=-1, keepdims=True)
                return z - (jnp.log(jnp.sum(jnp.exp(z - mx), axis=-1,
                                            keepdims=True)) + mx)

            lp0 = _log_softmax(lg0)
            lp1 = _log_softmax(lg1)
            # exact two-term logaddexp using a single exp (EUP-friendly)
            avg = (jnp.maximum(lp0, lp1)
                   + jnp.log(1.0 + jnp.exp(-jnp.abs(lp0 - lp1)))
                   - jnp.float32(math.log(NUM_MODELS)))
            avg = jnp.where(jnp.isnan(avg), -jnp.inf, avg)
            avg = jnp.where((lane_v == pad) | (lane_v == unk), -jnp.inf, avg)

            best = jnp.max(avg, axis=-1, keepdims=True)       # (1, 1)
            idx_i = jnp.min(jnp.where(avg == best, lane_v, V),
                            axis=-1, keepdims=True)           # (1, 1) int32

            # emit row `step`: [token, score, context(clamped), valid, 0...]
            # (token id is exact in f32 since VOCAB << 2**24)
            ctx_clip = jnp.minimum(new_ctx_f, jnp.float32(S))
            row_vec = jnp.where(lane_o == 0, idx_i.astype(jnp.float32),
                      jnp.where(lane_o == 1, best,
                      jnp.where(lane_o == 2, ctx_clip,
                      jnp.where(lane_o == 3, 1.0, 0.0))))
            out_ref[pl.ds(step, 1), :] = row_vec

            # state update: ctx stays vector-valued; the new token goes through
            # a tiny VMEM staging block so the scalar core can read it back.
            ctx_ref[...] = new_ctx_f.astype(jnp.int32)
            tokbuf_ref[...] = idx_i
            tok_s = tokbuf_ref[0, 0]
            state_ref[0] = tok_s
            state_ref[1] = (tok_s == eos).astype(jnp.int32)

        return carry

    lax.fori_loop(0, t_max, token_step, 0)


@functools.partial(jax.jit, static_argnames=("shift", "write_threshold", "t_max"))
def generate_tokens(params, src_tokens_1d, *, shift, write_threshold, t_max):
    """Whole greedy read/write decoding loop in ONE Pallas dispatch.

    Returns a (t_rows, 128) f32 meta block: lane0=token id, lane1=avg log-prob,
    lane2=context (clamped to src_len), lane3=valid flag.  Rows past the
    emitted length are all-zero.
    """
    S = src_tokens_1d.shape[0]
    E4, H2, V2 = 4 * EMBED, 2 * HIDDEN, 2 * VOCAB
    t_rows = ((t_max + 7) // 8) * 8
    # source-embedding gather is glue (XLA gather, runs once per sentence)
    src_emb = jnp.take(params["emb_src_pad"], src_tokens_1d, axis=0)   # (S, 128)

    kernel = functools.partial(
        _generate_kernel,
        shift=int(shift), threshold=float(write_threshold), t_max=int(t_max),
        max_read_len=S + 1, src_len=S, eos=EOS, pad=PAD, unk=UNK)

    return pl.pallas_call(
        kernel,
        out_shape=jax.ShapeDtypeStruct((t_rows, LANES), jnp.float32),
        grid_spec=pltpu.PrefetchScalarGridSpec(
            num_scalar_prefetch=0,
            grid=(1,),
            in_specs=[
                pl.BlockSpec((S, LANES), lambda i: (0, 0)),     # src_emb (padded)
                pl.BlockSpec((LANES, E4), lambda i: (0, 0)),    # W_enc slab (bf16)
                pl.BlockSpec((1, E4), lambda i: (0, 0)),        # b_enc slab
                pl.BlockSpec((VOCAB, E4), lambda i: (0, 0)),    # emb_tgt slab
                pl.BlockSpec((E4, H2), lambda i: (0, 0)),       # W1 block-diag (bf16)
                pl.BlockSpec((1, H2), lambda i: (0, 0)),        # b1
                pl.BlockSpec((H2, V2), lambda i: (0, 0)),       # W2 block-diag (bf16)
                pl.BlockSpec((1, V2), lambda i: (0, 0)),        # b2
                pl.BlockSpec((1, HIDDEN), lambda i: (0, 0)),    # wd (decide, model 0)
                pl.BlockSpec((1, 1), lambda i: (0, 0)),         # bd (decide, model 0)
            ],
            out_specs=pl.BlockSpec((t_rows, LANES), lambda i: (0, 0)),
            scratch_shapes=[
                pltpu.SMEM((2,), jnp.int32),       # [last_token, done]
                pltpu.VMEM((1, 1), jnp.int32),     # running ctx (vector state)
                pltpu.VMEM((1, 1), jnp.int32),     # token staging (vec -> scalar)
            ],
        ),
        compiler_params=pltpu.CompilerParams(
            dimension_semantics=("arbitrary",)),
    )(src_emb, params["w_enc_slab"], params["b_enc_slab"],
      params["emb_tgt_slab"], params["w1_bd"], params["b1_cat"],
      params["w2_bd"], params["b2_cat"], params["wd0"], params["bd0"])


# ----------------------------------------------------------------------------
# Generator (host side only assembles the python result dict — 1 sync/sentence)
# ----------------------------------------------------------------------------
class DynamicPervasiveSequenceGenerator:
    """Greedy one-sentence simultaneous (read/write) sequence generator."""

    def __init__(self, params, tgt_dict, max_len_a=0, max_len_b=200, min_len=1,
                 match_source_len=False, eos=None, shift=1, write_threshold=0.5,
                 max_decoder_positions=1024):
        assert shift >= 1, "shift (initial context) must be >= 1"
        self.params = params
        self.pad = tgt_dict.pad()
        self.unk = tgt_dict.unk()
        self.eos = tgt_dict.eos() if eos is None else eos
        self.vocab_size = len(tgt_dict)
        self.max_len_a = max_len_a
        self.max_len_b = max_len_b
        self.min_len = min_len
        self.shift = shift
        self.write_threshold = write_threshold
        self.match_source_len = match_source_len
        self._max_decoder_positions = max_decoder_positions

    def forward(self, sample, prefix_tokens=None, bos_token=None):
        return self._generate(sample, prefix_tokens, bos_token)

    def _generate(self, sample, prefix_tokens=None, bos_token=None):
        src_tokens = sample["net_input"]["src_tokens"]           # (1, S) int32
        src_lengths = ((src_tokens != self.eos) &
                       (src_tokens != self.pad)).astype(jnp.int32).sum(axis=1)
        bsz, src_len = src_tokens.shape
        if self.match_source_len:
            max_len = int(src_lengths.max())
        else:
            max_len = min(int(self.max_len_a * src_len + self.max_len_b),
                          self._max_decoder_positions - 1)
        assert self.min_len <= max_len, \
            "min_len cannot be larger than max_len, please adjust these!"

        # TODO(synk): bsz > 1 batching (and using v7x's second TensorCore) would
        # need a leading 'parallel' grid axis; the reference module is
        # single-sentence greedy decoding, so we keep grid=(1,).
        t_max = max_len + 2     # torch loop emits at most max_len + 2 tokens
        meta = generate_tokens(self.params, src_tokens[0],
                               shift=int(self.shift),
                               write_threshold=float(self.write_threshold),
                               t_max=int(t_max))
        meta_h = jax.device_get(meta)     # the ONLY device->host sync / sentence

        # TODO(synk): variable-length truncation + python result-dict assembly
        # have no static-shape Pallas equivalent; they stay on host (cheap).
        n = int((meta_h[:, 3] > 0.5).sum())
        n = max(n, 1)
        tokens = [int(t) for t in meta_h[:n, 0]]
        scores = [float(s) for s in meta_h[:n, 1]]
        context = [int(c) for c in meta_h[:n, 2]]

        return [[{
            "tokens": jnp.asarray(tokens, dtype=jnp.float32),
            "score": sum(scores) / len(scores),
            "positional_scores": jnp.asarray(scores, dtype=jnp.float32),
            "alignment": None,
            "context": context,
        }]]


# ----------------------------------------------------------------------------
# Deterministic synthetic parameters (per-model weights -> stacked layouts)
# ----------------------------------------------------------------------------
def init_params(key):
    assert NUM_MODELS == 2
    M, V, E, H = NUM_MODELS, VOCAB, EMBED, HIDDEN
    ks = jax.random.split(key, 10)
    s = 0.1
    n = lambda k, shape: s * jax.random.normal(k, shape, jnp.float32)
    emb_src = n(ks[0], (M, V, E))
    emb_tgt = n(ks[1], (M, V, E))
    w_enc = n(ks[2], (M, E, E))
    b_enc = n(ks[3], (M, 1, E))
    w1t = n(ks[4], (M, E, H))
    w1s = n(ks[5], (M, E, H))
    b1 = n(ks[6], (M, 1, H))
    w2 = n(ks[7], (M, H, V))
    b2 = n(ks[8], (M, 1, V))
    wd = n(ks[9], (M, 1, H))
    bd = jnp.zeros((M, 1, 1), jnp.float32)

    # lane-dense source-embedding slab [src0 | src1 | 0-pad]   (V, 128)
    emb_src_pad = jnp.zeros((V, LANES), jnp.float32)
    emb_src_pad = emb_src_pad.at[:, 0:E].set(emb_src[0])
    emb_src_pad = emb_src_pad.at[:, E:2 * E].set(emb_src[1])

    # encoder weights producing the decoder slab layout [0|enc0|0|enc1] (4E)
    w_enc_slab = jnp.zeros((LANES, 4 * E), jnp.float32)
    w_enc_slab = w_enc_slab.at[0:E, E:2 * E].set(w_enc[0])
    w_enc_slab = w_enc_slab.at[E:2 * E, 3 * E:4 * E].set(w_enc[1])
    b_enc_slab = jnp.zeros((1, 4 * E), jnp.float32)
    b_enc_slab = b_enc_slab.at[:, E:2 * E].set(b_enc[0])
    b_enc_slab = b_enc_slab.at[:, 3 * E:4 * E].set(b_enc[1])

    # target-embedding slab [tgt0 | 0 | tgt1 | 0]  (kept f32: row-gathered)
    emb_tgt_slab = jnp.zeros((V, 4 * E), jnp.float32)
    emb_tgt_slab = emb_tgt_slab.at[:, 0:E].set(emb_tgt[0])
    emb_tgt_slab = emb_tgt_slab.at[:, 2 * E:3 * E].set(emb_tgt[1])

    # W1 block-diagonal: merged tgt/src halves per model, models along N (2H)
    w1_bd = jnp.zeros((4 * E, 2 * H), jnp.float32)
    w1_bd = w1_bd.at[0:E, 0:H].set(w1t[0])
    w1_bd = w1_bd.at[E:2 * E, 0:H].set(w1s[0])
    w1_bd = w1_bd.at[2 * E:3 * E, H:2 * H].set(w1t[1])
    w1_bd = w1_bd.at[3 * E:4 * E, H:2 * H].set(w1s[1])
    b1_cat = jnp.concatenate([b1[0], b1[1]], axis=-1)                  # (1, 2H)

    # W2 block-diagonal: models along N (2V = 256, fills the 256-wide MXU)
    w2_bd = jnp.zeros((2 * H, 2 * V), jnp.float32)
    w2_bd = w2_bd.at[0:H, 0:V].set(w2[0])
    w2_bd = w2_bd.at[H:2 * H, V:2 * V].set(w2[1])
    b2_cat = jnp.concatenate([b2[0], b2[1]], axis=-1)                  # (1, 2V)

    return {
        "emb_src_pad": emb_src_pad,
        "w_enc_slab": w_enc_slab.astype(jnp.bfloat16),   # MXU operand -> bf16
        "b_enc_slab": b_enc_slab,
        "emb_tgt_slab": emb_tgt_slab,
        "w1_bd": w1_bd.astype(jnp.bfloat16),             # MXU operand -> bf16
        "b1_cat": b1_cat,
        "w2_bd": w2_bd.astype(jnp.bfloat16),             # MXU operand -> bf16
        "b2_cat": b2_cat,
        "wd0": wd[0],          # (1, H)  decide head, model 0 only
        "bd0": bd[0],          # (1, 1)
    }


if __name__ == "__main__":
    key = jax.random.PRNGKey(0)
    pkey, skey = jax.random.split(key)
    params = init_params(pkey)

    # src sentence: 15 content tokens in [4, VOCAB) followed by EOS -> (1, 16)
    body = jax.random.randint(skey, (1, SRC_LEN - 1), 4, VOCAB, dtype=jnp.int32)
    src_tokens = jnp.concatenate([body, jnp.full((1, 1), EOS, jnp.int32)], axis=1)
    src_lengths = jnp.array([SRC_LEN - 1], jnp.int32)
    sample = {"net_input": {"src_tokens": src_tokens, "src_lengths": src_lengths}}

    gen = DynamicPervasiveSequenceGenerator(
        params, TgtDict(), max_len_a=0, max_len_b=8,
        shift=1, write_threshold=0.5)

    hypos = gen.forward(sample)
    hyp = hypos[0][0]

    # also block directly on a raw fused-kernel invocation
    meta = generate_tokens(params, src_tokens[0],
                           shift=1, write_threshold=0.5, t_max=10)
    jax.block_until_ready(meta)
    jax.block_until_ready(hyp["tokens"])

    # structural sanity checks (hold independently of float rounding)
    n_tok = int(hyp["tokens"].shape[0])
    assert 1 <= n_tok <= 10
    assert len(hyp["context"]) == n_tok
    assert all(1 <= c <= SRC_LEN for c in hyp["context"])
    assert all(hyp["context"][i] <= hyp["context"][i + 1]
               for i in range(n_tok - 1))
    assert all(0 <= int(t) < VOCAB for t in jax.device_get(hyp["tokens"]))

    print("KERNEL_OK")
</pallas_src>

<mosaic_0001>
module attributes {stable_mosaic.version = 11 : i64} {
  func.func @_generate_kernel(%arg0: i32, %arg1: memref<16x128xf32, #tpu.memory_space<vmem>>, %arg2: memref<128x128xbf16, #tpu.memory_space<vmem>>, %arg3: memref<1x128xf32, #tpu.memory_space<vmem>>, %arg4: memref<128x128xf32, #tpu.memory_space<vmem>>, %arg5: memref<128x256xbf16, #tpu.memory_space<vmem>>, %arg6: memref<1x256xf32, #tpu.memory_space<vmem>>, %arg7: memref<256x256xbf16, #tpu.memory_space<vmem>>, %arg8: memref<1x256xf32, #tpu.memory_space<vmem>>, %arg9: memref<1x128xf32, #tpu.memory_space<vmem>>, %arg10: memref<1x1xf32, #tpu.memory_space<vmem>>, %arg11: memref<16x128xf32, #tpu.memory_space<vmem>>, %arg12: memref<2xi32, #tpu.memory_space<smem>>, %arg13: memref<1x1xi32, #tpu.memory_space<vmem>>, %arg14: memref<1x1xi32, #tpu.memory_space<vmem>>) attributes {dimension_semantics = [#tpu.dimension_semantics<arbitrary>], iteration_bounds = array<i64: 1>, scalar_prefetch = 0 : i64, scratch_operands = 3 : i64, tpu.core_type = #tpu.core_type<tc>, window_params = [{pipeline_mode = #tpu.pipeline_mode<synchronous>, transform_indices = @transform_0, window_bounds = array<i64: 16, 128>}, {pipeline_mode = #tpu.pipeline_mode<synchronous>, transform_indices = @transform_1, window_bounds = array<i64: 128, 128>}, {pipeline_mode = #tpu.pipeline_mode<synchronous>, transform_indices = @transform_2, window_bounds = array<i64: 1, 128>}, {pipeline_mode = #tpu.pipeline_mode<synchronous>, transform_indices = @transform_3, window_bounds = array<i64: 128, 128>}, {pipeline_mode = #tpu.pipeline_mode<synchronous>, transform_indices = @transform_4, window_bounds = array<i64: 128, 256>}, {pipeline_mode = #tpu.pipeline_mode<synchronous>, transform_indices = @transform_5, window_bounds = array<i64: 1, 256>}, {pipeline_mode = #tpu.pipeline_mode<synchronous>, transform_indices = @transform_6, window_bounds = array<i64: 256, 256>}, {pipeline_mode = #tpu.pipeline_mode<synchronous>, transform_indices = @transform_7, window_bounds = array<i64: 1, 256>}, {pipeline_mode = #tpu.pipeline_mode<synchronous>, transform_indices = @transform_8, window_bounds = array<i64: 1, 128>}, {pipeline_mode = #tpu.pipeline_mode<synchronous>, transform_indices = @transform_9, window_bounds = array<i64: 1, 1>}, {pipeline_mode = #tpu.pipeline_mode<synchronous>, transform_indices = @transform_10, window_bounds = array<i64: 16, 128>}]} {
    %cst = arith.constant 0.000000e+00 : f32
    %0 = vector.broadcast %cst : f32 to vector<16x128xf32>
    %c0 = arith.constant 0 : index
    %c0_0 = arith.constant 0 : index
    %1 = vector.load %arg11[%c0, %c0_0] : memref<16x128xf32, #tpu.memory_space<vmem>>, vector<16x128xf32>
    tpu.vector_store %arg11[%c0, %c0_0], %0 {strides = array<i32>} : memref<16x128xf32, #tpu.memory_space<vmem>>, vector<16x128xf32>,
    %c2_i32 = arith.constant 2 : i32
    %c0_1 = arith.constant 0 : index
    %2 = memref.load %arg12[%c0_1] : memref<2xi32, #tpu.memory_space<smem>>
    memref.store %c2_i32, %arg12[%c0_1] : memref<2xi32, #tpu.memory_space<smem>>
    %c0_i32 = arith.constant 0 : i32
    %c1 = arith.constant 1 : index
    %3 = memref.load %arg12[%c1] : memref<2xi32, #tpu.memory_space<smem>>
    memref.store %c0_i32, %arg12[%c1] : memref<2xi32, #tpu.memory_space<smem>>
    %c1_i32 = arith.constant 1 : i32
    %4 = vector.broadcast %c1_i32 : i32 to vector<1x1xi32>
    %c0_2 = arith.constant 0 : index
    %c0_3 = arith.constant 0 : index
    %5 = vector.load %arg13[%c0_2, %c0_3] : memref<1x1xi32, #tpu.memory_space<vmem>>, vector<1x1xi32>
    tpu.vector_store %arg13[%c0_2, %c0_3], %4 {strides = array<i32>} : memref<1x1xi32, #tpu.memory_space<vmem>>, vector<1x1xi32>,
    %c0_4 = arith.constant 0 : index
    %c0_5 = arith.constant 0 : index
    %6 = vector.load %arg1[%c0_4, %c0_5] : memref<16x128xf32, #tpu.memory_space<vmem>>, vector<16x128xf32>
    %7 = arith.truncf %6 : vector<16x128xf32> to vector<16x128xbf16>
    %c0_6 = arith.constant 0 : index
    %c0_7 = arith.constant 0 : index
    %8 = vector.load %arg2[%c0_6, %c0_7] : memref<128x128xbf16, #tpu.memory_space<vmem>>, vector<128x128xbf16>
    %cst_8 = arith.constant dense<0.000000e+00> : vector<16x128xf32>
    %9 = tpu.matmul %7, %8, %cst_8 {dimension_numbers = #tpu.dot_dimension_numbers<[1], [0], [0], [1], [0, 0, 1, 1], [], []>} : vector<16x128xbf16>, vector<128x128xbf16>, vector<16x128xf32> -> vector<16x128xf32>
    %c0_9 = arith.constant 0 : index
    %c0_10 = arith.constant 0 : index
    %10 = vector.load %arg3[%c0_9, %c0_10] : memref<1x128xf32, #tpu.memory_space<vmem>>, vector<1x128xf32>
    %11 = vector.broadcast %10 : vector<1x128xf32> to vector<16x128xf32>
    %12 = arith.addf %9, %11 : vector<16x128xf32>
    %cst_11 = arith.constant 0.000000e+00 : f32
    %13 = vector.broadcast %cst_11 : f32 to vector<16x128xf32>
    %14 = arith.maximumf %12, %13 : vector<16x128xf32>
    %15 = tpu.iota {dimensions = array<i32: 0>} : vector<16x1xi32>
    %16 = tpu.iota {dimensions = array<i32: 0>} : vector<16x256xi32>
    %17 = tpu.iota {dimensions = array<i32: 1>} : vector<1x128xi32>
    %18 = tpu.iota {dimensions = array<i32: 1>} : vector<1x128xi32>
    %c0_i32_12 = arith.constant 0 : i32
    %c10_i32 = arith.constant 10 : i32
    %19 = arith.addi %c0_i32_12, %c10_i32 : i32
    %c1_i32_13 = arith.constant 1 : i32
    scf.for %arg15 = %c0_i32_12 to %19 step %c1_i32_13  : i32 {
      %c1_15 = arith.constant 1 : index
      %20 = memref.load %arg12[%c1_15] : memref<2xi32, #tpu.memory_space<smem>>
      %c0_i32_16 = arith.constant 0 : i32
      %21 = arith.cmpi eq, %20, %c0_i32_16 : i32
      %22 = arith.extui %21 : i1 to i32
      %c0_i32_17 = arith.constant 0 : i32
      %23 = arith.cmpi ne, %22, %c0_i32_17 : i32
      scf.if %23 {
        %c0_18 = arith.constant 0 : index
        %24 = memref.load %arg12[%c0_18] : memref<2xi32, #tpu.memory_space<smem>>
        %c0_19 = arith.constant 0 : index
        %c0_20 = arith.constant 0 : index
        %25 = vector.load %arg13[%c0_19, %c0_20] : memref<1x1xi32, #tpu.memory_space<vmem>>, vector<1x1xi32>
        %26 = arith.index_cast %24 : i32 to index
        %c0_21 = arith.constant 0 : index
        %27 = vector.load %arg4[%26, %c0_21] : memref<128x128xf32, #tpu.memory_space<vmem>>, vector<1x128xf32>
        %28 = vector.broadcast %27 : vector<1x128xf32> to vector<16x128xf32>
        %29 = arith.addf %14, %28 : vector<16x128xf32>
        %30 = arith.truncf %29 : vector<16x128xf32> to vector<16x128xbf16>
        %c0_22 = arith.constant 0 : index
        %c0_23 = arith.constant 0 : index
        %31 = vector.load %arg5[%c0_22, %c0_23] : memref<128x256xbf16, #tpu.memory_space<vmem>>, vector<128x256xbf16>
        %cst_24 = arith.constant dense<0.000000e+00> : vector<16x256xf32>
        %32 = tpu.matmul %30, %31, %cst_24 {dimension_numbers = #tpu.dot_dimension_numbers<[1], [0], [0], [1], [0, 0, 1, 1], [], []>} : vector<16x128xbf16>, vector<128x256xbf16>, vector<16x256xf32> -> vector<16x256xf32>
        %c0_25 = arith.constant 0 : index
        %c0_26 = arith.constant 0 : index
        %33 = vector.load %arg6[%c0_25, %c0_26] : memref<1x256xf32, #tpu.memory_space<vmem>>, vector<1x256xf32>
        %34 = vector.broadcast %33 : vector<1x256xf32> to vector<16x256xf32>
        %35 = arith.addf %32, %34 : vector<16x256xf32>
        %cst_27 = arith.constant 0.000000e+00 : f32
        %36 = vector.broadcast %cst_27 : f32 to vector<16x256xf32>
        %37 = arith.maximumf %35, %36 : vector<16x256xf32>
        %c1_i32_28 = arith.constant 1 : i32
        %38 = tpu.dynamic_rotate %37 by %c1_i32_28 dim 0 : vector<16x256xf32>, i32 -> vector<16x256xf32>
        %c1_i32_29 = arith.constant 1 : i32
        %39 = vector.broadcast %c1_i32_29 : i32 to vector<16x256xi32>
        %40 = arith.cmpi slt, %16, %39 : vector<16x256xi32>
        %cst_30 = arith.constant 0xFF800000 : f32
        %41 = vector.broadcast %cst_30 : f32 to vector<16x256xf32>
        %42 = arith.select %40, %41, %38 : vector<16x256xi1>, vector<16x256xf32>
        %43 = arith.maximumf %37, %42 : vector<16x256xf32>
        %c2_i32_31 = arith.constant 2 : i32
        %44 = tpu.dynamic_rotate %43 by %c2_i32_31 dim 0 : vector<16x256xf32>, i32 -> vector<16x256xf32>
        %c2_i32_32 = arith.constant 2 : i32
        %45 = vector.broadcast %c2_i32_32 : i32 to vector<16x256xi32>
        %46 = arith.cmpi slt, %16, %45 : vector<16x256xi32>
        %cst_33 = arith.constant 0xFF800000 : f32
        %47 = vector.broadcast %cst_33 : f32 to vector<16x256xf32>
        %48 = arith.select %46, %47, %44 : vector<16x256xi1>, vector<16x256xf32>
        %49 = arith.maximumf %43, %48 : vector<16x256xf32>
        %c4_i32 = arith.constant 4 : i32
        %50 = tpu.dynamic_rotate %49 by %c4_i32 dim 0 : vector<16x256xf32>, i32 -> vector<16x256xf32>
        %c4_i32_34 = arith.constant 4 : i32
        %51 = vector.broadcast %c4_i32_34 : i32 to vector<16x256xi32>
        %52 = arith.cmpi slt, %16, %51 : vector<16x256xi32>
        %cst_35 = arith.constant 0xFF800000 : f32
        %53 = vector.broadcast %cst_35 : f32 to vector<16x256xf32>
        %54 = arith.select %52, %53, %50 : vector<16x256xi1>, vector<16x256xf32>
        %55 = arith.maximumf %49, %54 : vector<16x256xf32>
        %c8_i32 = arith.constant 8 : i32
        %56 = tpu.dynamic_rotate %55 by %c8_i32 dim 0 : vector<16x256xf32>, i32 -> vector<16x256xf32>
        %c8_i32_36 = arith.constant 8 : i32
        %57 = vector.broadcast %c8_i32_36 : i32 to vector<16x256xi32>
        %58 = arith.cmpi slt, %16, %57 : vector<16x256xi32>
        %cst_37 = arith.constant 0xFF800000 : f32
        %59 = vector.broadcast %cst_37 : f32 to vector<16x256xf32>
        %60 = arith.select %58, %59, %56 : vector<16x256xi1>, vector<16x256xf32>
        %61 = arith.maximumf %55, %60 : vector<16x256xf32>
        %62 = vector.extract_strided_slice %61 {offsets = [0, 0], sizes = [16, 128], strides = [1, 1]} : vector<16x256xf32> to vector<16x128xf32>
        %c0_38 = arith.constant 0 : index
        %c0_39 = arith.constant 0 : index
        %63 = vector.load %arg9[%c0_38, %c0_39] : memref<1x128xf32, #tpu.memory_space<vmem>>, vector<1x128xf32>
        %64 = vector.broadcast %63 : vector<1x128xf32> to vector<16x128xf32>
        %65 = arith.mulf %62, %64 : vector<16x128xf32>
        %cst_40 = arith.constant dense<0.000000e+00> : vector<16xf32>
        %66 = vector.multi_reduction <add>, %65, %cst_40 [1] : vector<16x128xf32> to vector<16xf32>
        %67 = vector.shape_cast %66 : vector<16xf32> to vector<16x1xf32>
        %c0_41 = arith.constant 0 : index
        %c0_42 = arith.constant 0 : index
        %68 = vector.load %arg10[%c0_41, %c0_42] : memref<1x1xf32, #tpu.memory_space<vmem>>, vector<1x1xf32>
        %69 = vector.extract %68[0, 0] : f32 from vector<1x1xf32>
        %70 = vector.broadcast %69 : f32 to vector<16x1xf32>
        %71 = arith.addf %67, %70 : vector<16x1xf32>
        %72 = arith.negf %71 : vector<16x1xf32>
        %73 = math.exp %72 : vector<16x1xf32>
        %cst_43 = arith.constant 1.000000e+00 : f32
        %74 = vector.broadcast %cst_43 : f32 to vector<16x1xf32>
        %75 = arith.addf %74, %73 : vector<16x1xf32>
        %76 = arith.divf %74, %75 : vector<16x1xf32>
        %c1_i32_44 = arith.constant 1 : i32
        %77 = vector.broadcast %c1_i32_44 : i32 to vector<16x1xi32>
        %78 = arith.addi %15, %77 : vector<16x1xi32>
        %79 = vector.broadcast %25 : vector<1x1xi32> to vector<16x1xi32>
        %80 = arith.cmpi sge, %78, %79 : vector<16x1xi32>
        %cst_45 = arith.constant 5.000000e-01 : f32
        %81 = vector.broadcast %cst_45 : f32 to vector<16x1xf32>
        %82 = arith.cmpf ogt, %76, %81 : vector<16x1xf32>
        %83 = arith.andi %80, %82 : vector<16x1xi1>
        %84 = arith.sitofp %78 : vector<16x1xi32> to vector<16x1xf32>
        %cst_46 = arith.constant 1.700000e+01 : f32
        %85 = vector.broadcast %cst_46 : f32 to vector<16x1xf32>
        %86 = arith.select %83, %84, %85 : vector<16x1xi1>, vector<16x1xf32>
        %cst_47 = arith.constant dense<0x7F800000> : vector<1xf32>
        %87 = vector.multi_reduction <minimumf>, %86, %cst_47 [0] : vector<16x1xf32> to vector<1xf32>
        %88 = vector.shape_cast %87 : vector<1xf32> to vector<1x1xf32>
        %89 = arith.sitofp %25 : vector<1x1xi32> to vector<1x1xf32>
        %90 = arith.maximumf %88, %89 : vector<1x1xf32>
        %cst_48 = arith.constant 1.600000e+01 : f32
        %91 = vector.broadcast %cst_48 : f32 to vector<1x1xf32>
        %92 = arith.minimumf %90, %91 : vector<1x1xf32>
        %cst_49 = arith.constant 1.000000e+00 : f32
        %93 = vector.broadcast %cst_49 : f32 to vector<1x1xf32>
        %94 = arith.subf %92, %93 : vector<1x1xf32>
        %95 = arith.sitofp %15 : vector<16x1xi32> to vector<16x1xf32>
        %96 = vector.broadcast %94 : vector<1x1xf32> to vector<16x1xf32>
        %97 = arith.cmpf oeq, %95, %96 : vector<16x1xf32>
        %98 = arith.truncf %61 : vector<16x256xf32> to vector<16x256xbf16>
        %c0_50 = arith.constant 0 : index
        %c0_51 = arith.constant 0 : index
        %99 = vector.load %arg7[%c0_50, %c0_51] : memref<256x256xbf16, #tpu.memory_space<vmem>>, vector<256x256xbf16>
        %cst_52 = arith.constant dense<0.000000e+00> : vector<16x256xf32>
        %100 = tpu.matmul %98, %99, %cst_52 {dimension_numbers = #tpu.dot_dimension_numbers<[1], [0], [0], [1], [0, 0, 1, 1], [], []>} : vector<16x256xbf16>, vector<256x256xbf16>, vector<16x256xf32> -> vector<16x256xf32>
        %c0_53 = arith.constant 0 : index
        %c0_54 = arith.constant 0 : index
        %101 = vector.load %arg8[%c0_53, %c0_54] : memref<1x256xf32, #tpu.memory_space<vmem>>, vector<1x256xf32>
        %102 = vector.broadcast %101 : vector<1x256xf32> to vector<16x256xf32>
        %103 = arith.addf %100, %102 : vector<16x256xf32>
        %cst_55 = arith.constant 0.000000e+00 : f32
        %104 = vector.shape_cast %97 : vector<16x1xi1> to vector<16x1xi1>
        %105 = vector.broadcast %104 : vector<16x1xi1> to vector<16x256xi1>
        %106 = vector.broadcast %cst_55 : f32 to vector<16x256xf32>
        %107 = arith.select %105, %103, %106 : vector<16x256xi1>, vector<16x256xf32>
        %cst_56 = arith.constant dense<0.000000e+00> : vector<256xf32>
        %108 = vector.multi_reduction <add>, %107, %cst_56 [0] : vector<16x256xf32> to vector<256xf32>
        %109 = vector.shape_cast %108 : vector<256xf32> to vector<1x256xf32>
        %110 = vector.extract_strided_slice %109 {offsets = [0, 0], sizes = [1, 128], strides = [1, 1]} : vector<1x256xf32> to vector<1x128xf32>
        %111 = vector.extract_strided_slice %109 {offsets = [0, 128], sizes = [1, 128], strides = [1, 1]} : vector<1x256xf32> to vector<1x128xf32>
        %cst_57 = arith.constant dense<0xFF800000> : vector<1xf32>
        %112 = vector.multi_reduction <maximumf>, %110, %cst_57 [1] : vector<1x128xf32> to vector<1xf32>
        %113 = vector.shape_cast %112 : vector<1xf32> to vector<1x1xf32>
        %114 = vector.broadcast %113 : vector<1x1xf32> to vector<1x128xf32>
        %115 = arith.subf %110, %114 : vector<1x128xf32>
        %116 = math.exp %115 : vector<1x128xf32>
        %cst_58 = arith.constant dense<0.000000e+00> : vector<1xf32>
        %117 = vector.multi_reduction <add>, %116, %cst_58 [1] : vector<1x128xf32> to vector<1xf32>
        %118 = vector.shape_cast %117 : vector<1xf32> to vector<1x1xf32>
        %119 = math.log %118 : vector<1x1xf32>
        %120 = arith.addf %119, %113 : vector<1x1xf32>
        %121 = vector.broadcast %120 : vector<1x1xf32> to vector<1x128xf32>
        %122 = arith.subf %110, %121 : vector<1x128xf32>
        %cst_59 = arith.constant dense<0xFF800000> : vector<1xf32>
        %123 = vector.multi_reduction <maximumf>, %111, %cst_59 [1] : vector<1x128xf32> to vector<1xf32>
        %124 = vector.shape_cast %123 : vector<1xf32> to vector<1x1xf32>
        %125 = vector.broadcast %124 : vector<1x1xf32> to vector<1x128xf32>
        %126 = arith.subf %111, %125 : vector<1x128xf32>
        %127 = math.exp %126 : vector<1x128xf32>
        %cst_60 = arith.constant dense<0.000000e+00> : vector<1xf32>
        %128 = vector.multi_reduction <add>, %127, %cst_60 [1] : vector<1x128xf32> to vector<1xf32>
        %129 = vector.shape_cast %128 : vector<1xf32> to vector<1x1xf32>
        %130 = math.log %129 : vector<1x1xf32>
        %131 = arith.addf %130, %124 : vector<1x1xf32>
        %132 = vector.broadcast %131 : vector<1x1xf32> to vector<1x128xf32>
        %133 = arith.subf %111, %132 : vector<1x128xf32>
        %134 = arith.maximumf %122, %133 : vector<1x128xf32>
        %135 = arith.subf %122, %133 : vector<1x128xf32>
        %136 = math.absf %135 : vector<1x128xf32>
        %cst_61 = arith.constant 0.000000e+00 : f32
        %137 = vector.broadcast %cst_61 : f32 to vector<1x128xf32>
        %138 = arith.subf %137, %136 : vector<1x128xf32>
        %139 = math.exp %138 : vector<1x128xf32>
        %cst_62 = arith.constant 1.000000e+00 : f32
        %140 = vector.broadcast %cst_62 : f32 to vector<1x128xf32>
        %141 = arith.addf %140, %139 : vector<1x128xf32>
        %142 = math.log %141 : vector<1x128xf32>
        %143 = arith.addf %134, %142 : vector<1x128xf32>
        %cst_63 = arith.constant 0.693147182 : f32
        %144 = vector.broadcast %cst_63 : f32 to vector<1x128xf32>
        %145 = arith.subf %143, %144 : vector<1x128xf32>
        %146 = arith.cmpf one, %145, %145 : vector<1x128xf32>
        %cst_64 = arith.constant 0xFF800000 : f32
        %147 = vector.broadcast %cst_64 : f32 to vector<1x128xf32>
        %148 = arith.select %146, %147, %145 : vector<1x128xi1>, vector<1x128xf32>
        %c1_i32_65 = arith.constant 1 : i32
        %149 = vector.broadcast %c1_i32_65 : i32 to vector<1x128xi32>
        %150 = arith.cmpi eq, %17, %149 : vector<1x128xi32>
        %c3_i32 = arith.constant 3 : i32
        %151 = vector.broadcast %c3_i32 : i32 to vector<1x128xi32>
        %152 = arith.cmpi eq, %17, %151 : vector<1x128xi32>
        %153 = arith.ori %150, %152 : vector<1x128xi1>
        %cst_66 = arith.constant 0xFF800000 : f32
        %154 = vector.broadcast %cst_66 : f32 to vector<1x128xf32>
        %155 = arith.select %153, %154, %148 : vector<1x128xi1>, vector<1x128xf32>
        %cst_67 = arith.constant dense<0xFF800000> : vector<1xf32>
        %156 = vector.multi_reduction <maximumf>, %155, %cst_67 [1] : vector<1x128xf32> to vector<1xf32>
        %157 = vector.shape_cast %156 : vector<1xf32> to vector<1x1xf32>
        %158 = vector.broadcast %157 : vector<1x1xf32> to vector<1x128xf32>
        %159 = arith.cmpf oeq, %155, %158 : vector<1x128xf32>
        %c128_i32 = arith.constant 128 : i32
        %160 = vector.broadcast %c128_i32 : i32 to vector<1x128xi32>
        %161 = arith.select %159, %17, %160 : vector<1x128xi1>, vector<1x128xi32>
        %cst_68 = arith.constant dense<2147483647> : vector<1xi32>
        %162 = vector.multi_reduction <minsi>, %161, %cst_68 [1] : vector<1x128xi32> to vector<1xi32>
        %163 = vector.shape_cast %162 : vector<1xi32> to vector<1x1xi32>
        %cst_69 = arith.constant 1.600000e+01 : f32
        %164 = vector.broadcast %cst_69 : f32 to vector<1x1xf32>
        %165 = arith.minimumf %90, %164 : vector<1x1xf32>
        %c0_i32_70 = arith.constant 0 : i32
        %166 = vector.broadcast %c0_i32_70 : i32 to vector<1x128xi32>
        %167 = arith.cmpi eq, %18, %166 : vector<1x128xi32>
        %168 = arith.sitofp %163 : vector<1x1xi32> to vector<1x1xf32>
        %c1_i32_71 = arith.constant 1 : i32
        %169 = vector.broadcast %c1_i32_71 : i32 to vector<1x128xi32>
        %170 = arith.cmpi eq, %18, %169 : vector<1x128xi32>
        %c2_i32_72 = arith.constant 2 : i32
        %171 = vector.broadcast %c2_i32_72 : i32 to vector<1x128xi32>
        %172 = arith.cmpi eq, %18, %171 : vector<1x128xi32>
        %c3_i32_73 = arith.constant 3 : i32
        %173 = vector.broadcast %c3_i32_73 : i32 to vector<1x128xi32>
        %174 = arith.cmpi eq, %18, %173 : vector<1x128xi32>
        %cst_74 = arith.constant 1.000000e+00 : f32
        %cst_75 = arith.constant 0.000000e+00 : f32
        %175 = vector.broadcast %cst_74 : f32 to vector<1x128xf32>
        %176 = vector.broadcast %cst_75 : f32 to vector<1x128xf32>
        %177 = arith.select %174, %175, %176 : vector<1x128xi1>, vector<1x128xf32>
        %178 = vector.shape_cast %165 : vector<1x1xf32> to vector<1x1xf32>
        %179 = vector.broadcast %178 : vector<1x1xf32> to vector<1x128xf32>
        %180 = arith.select %172, %179, %177 : vector<1x128xi1>, vector<1x128xf32>
        %181 = vector.shape_cast %157 : vector<1x1xf32> to vector<1x1xf32>
        %182 = vector.broadcast %181 : vector<1x1xf32> to vector<1x128xf32>
        %183 = arith.select %170, %182, %180 : vector<1x128xi1>, vector<1x128xf32>
        %184 = vector.shape_cast %168 : vector<1x1xf32> to vector<1x1xf32>
        %185 = vector.broadcast %184 : vector<1x1xf32> to vector<1x128xf32>
        %186 = arith.select %167, %185, %183 : vector<1x128xi1>, vector<1x128xf32>
        %187 = arith.index_cast %arg15 : i32 to index
        %c0_76 = arith.constant 0 : index
        %188 = vector.load %arg11[%187, %c0_76] : memref<16x128xf32, #tpu.memory_space<vmem>>, vector<1x128xf32>
        tpu.vector_store %arg11[%187, %c0_76], %186 {strides = array<i32>} : memref<16x128xf32, #tpu.memory_space<vmem>>, vector<1x128xf32>,
        %189 = arith.fptosi %90 : vector<1x1xf32> to vector<1x1xi32>
        %c0_77 = arith.constant 0 : index
        %c0_78 = arith.constant 0 : index
        %190 = vector.load %arg13[%c0_77, %c0_78] : memref<1x1xi32, #tpu.memory_space<vmem>>, vector<1x1xi32>
        tpu.vector_store %arg13[%c0_77, %c0_78], %189 {strides = array<i32>} : memref<1x1xi32, #tpu.memory_space<vmem>>, vector<1x1xi32>,
        %c0_79 = arith.constant 0 : index
        %c0_80 = arith.constant 0 : index
        %191 = vector.load %arg14[%c0_79, %c0_80] : memref<1x1xi32, #tpu.memory_space<vmem>>, vector<1x1xi32>
        tpu.vector_store %arg14[%c0_79, %c0_80], %163 {strides = array<i32>} : memref<1x1xi32, #tpu.memory_space<vmem>>, vector<1x1xi32>,
        %c0_81 = arith.constant 0 : index
        %c0_82 = arith.constant 0 : index
        %192 = vector.load %arg14[%c0_81, %c0_82] : memref<1x1xi32, #tpu.memory_space<vmem>>, vector<1x1xi32>
        %193 = vector.extract %192[0, 0] : i32 from vector<1x1xi32>
        %c0_83 = arith.constant 0 : index
        %194 = memref.load %arg12[%c0_83] : memref<2xi32, #tpu.memory_space<smem>>
        memref.store %193, %arg12[%c0_83] : memref<2xi32, #tpu.memory_space<smem>>
        %c2_i32_84 = arith.constant 2 : i32
        %195 = arith.cmpi eq, %193, %c2_i32_84 : i32
        %196 = arith.extui %195 : i1 to i32
        %c1_85 = arith.constant 1 : index
        %197 = memref.load %arg12[%c1_85] : memref<2xi32, #tpu.memory_space<smem>>
        memref.store %196, %arg12[%c1_85] : memref<2xi32, #tpu.memory_space<smem>>
      } else {
      }
    }
    %c10_i32_14 = arith.constant 10 : i32
    return
  }
  func.func @transform_0(%arg0: i32) -> (i32, i32) {
    %c0_i32 = arith.constant 0 : i32
    %c0_i32_0 = arith.constant 0 : i32
    %c0_i32_1 = arith.constant 0 : i32
    return %c0_i32, %c0_i32_0 : i32, i32
  }
  func.func @transform_1(%arg0: i32) -> (i32, i32) {
    %c0_i32 = arith.constant 0 : i32
    %c0_i32_0 = arith.constant 0 : i32
    %c0_i32_1 = arith.constant 0 : i32
    return %c0_i32, %c0_i32_0 : i32, i32
  }
  func.func @transform_2(%arg0: i32) -> (i32, i32) {
    %c0_i32 = arith.constant 0 : i32
    %c0_i32_0 = arith.constant 0 : i32
    %c0_i32_1 = arith.constant 0 : i32
    return %c0_i32, %c0_i32_0 : i32, i32
  }
  func.func @transform_3(%arg0: i32) -> (i32, i32) {
    %c0_i32 = arith.constant 0 : i32
    %c0_i32_0 = arith.constant 0 : i32
    %c0_i32_1 = arith.constant 0 : i32
    return %c0_i32, %c0_i32_0 : i32, i32
  }
  func.func @transform_4(%arg0: i32) -> (i32, i32) {
    %c0_i32 = arith.constant 0 : i32
    %c0_i32_0 = arith.constant 0 : i32
    %c0_i32_1 = arith.constant 0 : i32
    return %c0_i32, %c0_i32_0 : i32, i32
  }
  func.func @transform_5(%arg0: i32) -> (i32, i32) {
    %c0_i32 = arith.constant 0 : i32
    %c0_i32_0 = arith.constant 0 : i32
    %c0_i32_1 = arith.constant 0 : i32
    return %c0_i32, %c0_i32_0 : i32, i32
  }
  func.func @transform_6(%arg0: i32) -> (i32, i32) {
    %c0_i32 = arith.constant 0 : i32
    %c0_i32_0 = arith.constant 0 : i32
    %c0_i32_1 = arith.constant 0 : i32
    return %c0_i32, %c0_i32_0 : i32, i32
  }
  func.func @transform_7(%arg0: i32) -> (i32, i32) {
    %c0_i32 = arith.constant 0 : i32
    %c0_i32_0 = arith.constant 0 : i32
    %c0_i32_1 = arith.constant 0 : i32
    return %c0_i32, %c0_i32_0 : i32, i32
  }
  func.func @transform_8(%arg0: i32) -> (i32, i32) {
    %c0_i32 = arith.constant 0 : i32
    %c0_i32_0 = arith.constant 0 : i32
    %c0_i32_1 = arith.constant 0 : i32
    return %c0_i32, %c0_i32_0 : i32, i32
  }
  func.func @transform_9(%arg0: i32) -> (i32, i32) {
    %c0_i32 = arith.constant 0 : i32
    %c0_i32_0 = arith.constant 0 : i32
    %c0_i32_1 = arith.constant 0 : i32
    return %c0_i32, %c0_i32_0 : i32, i32
  }
  func.func @transform_10(%arg0: i32) -> (i32, i32) {
    %c0_i32 = arith.constant 0 : i32
    %c0_i32_0 = arith.constant 0 : i32
    %c0_i32_1 = arith.constant 0 : i32
    return %c0_i32, %c0_i32_0 : i32, i32
  }
}

</mosaic_0001>

<bundles_post_ra>
// kernel: generate_tokens.1
= control target key start
LH: loop header
LB: loop body
LE: loop exit
PB: predicated region body
PF: predicated region fallthrough
CT: control target
= control target key end

     0   :  { %s1424_s0 = inlined_call_operand.vmem [shape: f32[16,128], index: 0, kind: input, shape index: {}]   ;;  %s1425_s1 = inlined_call_operand.vmem [shape: bf16[128,128], index: 1, kind: input, shape index: {}]   ;;  %s1426_s2 = inlined_call_operand.vmem [shape: f32[1,128], index: 2, kind: input, shape index: {}]   ;;  %s1427_s3 = inlined_call_operand.vmem [shape: f32[128,128], index: 3, kind: input, shape index: {}]   ;;  %s1428_s4 = inlined_call_operand.hbm [shape: bf16[128,256], index: 4, kind: input, shape index: {}]   ;;  %s1429_s5 = inlined_call_operand.vmem [shape: f32[1,256], index: 5, kind: input, shape index: {}]   ;;  %s1430_s6 = inlined_call_operand.hbm [shape: bf16[256,256], index: 6, kind: input, shape index: {}]   ;;  %s1431_s7 = inlined_call_operand.vmem [shape: f32[1,256], index: 7, kind: input, shape index: {}]   ;;  %s1432_s8 = inlined_call_operand.vmem [shape: f32[1,128], index: 8, kind: input, shape index: {}]   ;;  %s1433_s9 = inlined_call_operand.<no memory space> [shape: f32[1,1], index: 9, kind: input, shape index: {}]   ;;  %s1434_s10 = inlined_call_operand.hbm [shape: f32[16,128], index: 10, kind: output, shape index: {}]  }
   0x1   :  { %v15_v0 = vstv %s1433_s9 }
   0x2   :  { %16 = vst [vmem:[#allocation5] sm:$0x1] %v15_v0 }
   0x3   :  { %17 = vsyncpa [#allocation7], 0 }
   0x4   :  { %18 = vsyncpa [#allocation10], 0 }
   0x5   :  { %19 = vsyncpa [#allocation8], 0  ;;  %s1190_s15 = smov [#allocation6]   ;;  %s1110_s19 = scalar_lea.hbm %s1428_s4, 2048 }
   0x6   :  { %s33_s16 = sshll.u32 %s1190_s15, 4  ;;  %p1111_p0 = scmp.ne.s32.totalorder %s1428_s4, %s1110_s19  ;;  %s34_s16 = int_to_ptr.vmem [resolvable:$true] %s33_s16 }
   0x7   :  { %p1114_p1 = scmp.lt.u32.totalorder %s1110_s19, %s1428_s4 }
   0x9   :  { %p1116_p2 = pnand %p1114_p1, %p1111_p0 }
   0xb   :  { %1119 = shalt.err (!%p1116_p2)
}
   0xc   :  { %s1120_s9 = scalar_lea.vmem %s34_s16, 2048  ;;  %p1125_p4 = scmp.lt.s32.totalorder %s34_s16, %s34_s16 }
   0xd   :  { %p1121_p3 = scmp.ne.s32.totalorder %s34_s16, %s1120_s9  ;;  %p1126_p5 = scmp.lt.s32.totalorder %s1120_s9, %s1120_s9 }
   0xf   :  { %p1127_p6 = por %p1126_p5, %p1125_p4 }
  0x11   :  { %p1128_p7 = pnand %p1127_p6, %p1121_p3 }
  0x13   :  { %1131 = shalt.err (!%p1128_p7)
}
  0x14   :  { %s1191_s24 = smov 128   ;;  %s1192_s25 = smov 8  }
  0x15   :  { %39 = dma.hbm_to_vmem [thread:$0]  %s1428_s4, 2048, %s34_s16, [#allocation7], %s1191_s24, %s1191_s24, %s1192_s25  }
  0x16   :  { %s1193_s28 = smov [#allocation9]   ;;  %s1132_s12 = scalar_lea.hbm %s1430_s6, 4096 }
  0x17   :  { %s47_s29 = sshll.u32 %s1193_s28, 4  ;;  %p1133_p8 = scmp.ne.s32.totalorder %s1430_s6, %s1132_s12  ;;  %s48_s29 = int_to_ptr.vmem [resolvable:$true] %s47_s29 }
  0x18   :  { %p1136_p9 = scmp.lt.u32.totalorder %s1132_s12, %s1430_s6 }
  0x1a   :  { %p1138_p10 = pnand %p1136_p9, %p1133_p8 }
  0x1c   :  { %1141 = shalt.err (!%p1138_p10)
}
  0x1d   :  { %s1142_s18 = scalar_lea.vmem %s48_s29, 4096  ;;  %p1147_p12 = scmp.lt.s32.totalorder %s48_s29, %s48_s29 }
  0x1e   :  { %p1143_p11 = scmp.ne.s32.totalorder %s48_s29, %s1142_s18  ;;  %p1148_p13 = scmp.lt.s32.totalorder %s1142_s18, %s1142_s18 }
  0x20   :  { %p1149_p0 = por %p1148_p13, %p1147_p12 }
  0x22   :  { %p1150_p1 = pnand %p1149_p0, %p1143_p11 }
  0x24   :  { %1153 = shalt.err (!%p1150_p1)
}
  0x25   :  { %53 = dma.hbm_to_vmem [thread:$0]  %s1430_s6, 4096, %s48_s29, [#allocation10], %s1191_s24, %s1191_s24, %s1192_s25  }
  0x26   :  { %1180 = dma.done.wait [#allocation7], 2048  }
  0x27   :  { %1181 = vsyncadd [#allocation7], 4294965248 }
  0x28   :  { %1182 = dma.done.wait [#allocation10], 4096  }
  0x29   :  { %1183 = vsyncadd [#allocation10], 4294963200  ;;  %vm73_vm0 = vcmask 0   ;;  %s1194_s19 = smov 2   ;;  %v1195_v1 = vmov 1   ;;  %s1196_s20 = smov 0   ;;  %v192_v14 = vlaneseq }
  0x2a   :  { %70 = sst [smem:[#allocation2]] %s1194_s19  ;;  %74 = vst.msk [vmem:[#allocation3] sm:$0x1] %vm73_vm0, %v1195_v1  ;;  %v1197_v2 = vmov 0.0   ;;  %vm1198_vm1 = vmmov 0   ;;  %v1008_v3 = vld [vmem:[%s1425_s1] sm:$0xff]  }
  0x2b   :  { %72 = sst [smem:[#allocation2 + $0x1]] %s1196_s20  ;;  %67 = vst [vmem:[#allocation11] sm:$0xff] %v1197_v2  ;;  %68 = vst [vmem:[#allocation11 + $0x8] sm:$0xff] %v1197_v2  ;;  %962 = vmatprep.subr.bf16.mxu0 %v1197_v2  ;;  %978 = vmatprep.mubr.msk.bf16.mxu0 %vm1198_vm1, %v1197_v2  ;;  %v1009_v4 = vld [vmem:[%s1425_s1 + $0x8] sm:$0xff]   ;;  %v1010_v5 = vld [vmem:[%s1425_s1 + $0x10] sm:$0xff]   ;;  %v1321_v15 = vshrl.u32 %v192_v14, 7 }
  0x2c   :  { %963 = vmatpush3.bf16.msra.mxu0 %v1008_v3  ;;  %v1011_v6 = vld [vmem:[%s1425_s1 + $0x18] sm:$0xff]   ;;  %v1012_v7 = vld [vmem:[%s1425_s1 + $0x20] sm:$0xff]   ;;  %v1013_v8 = vld [vmem:[%s1425_s1 + $0x28] sm:$0xff]   ;;  %v1326_v17 = vand.u32 127, %v192_v14 }
  0x2d   :  { %964 = vmatprep.subr.bf16.mxu0 %v1197_v2  ;;  %v1014_v9 = vld [vmem:[%s1425_s1 + $0x30] sm:$0xff]   ;;  %v1015_v10 = vld [vmem:[%s1425_s1 + $0x38] sm:$0xff]   ;;  %v75_v11 = vld [vmem:[%s1424_s0] sm:$0xff]  ;;  %v1324_v16 = vadd.s32 8, %v1321_v15 }
  0x2e   :  { %v76_v12 = vld [vmem:[%s1424_s0 + $0x8] sm:$0xff]  ;;  %v888_v18 = vld [vmem:[%s1426_s2] ss:$0 sm:$0xff]  ;;  %s1337_s0 = smov 0  }
  0x2f   :  { %v77_v13 = vpack.c.bf16 %v76_v12, %v75_v11 }
  0x30   :  { %965 = vmatpush3.bf16.msra.mxu0 %v1009_v4 }
  0x31   :  { %966 = vmatprep.subr.bf16.mxu0 %v1197_v2 }
  0x34   :  { %967 = vmatpush3.bf16.msra.mxu0 %v1010_v5 }
  0x35   :  { %968 = vmatprep.subr.bf16.mxu0 %v1197_v2 }
  0x38   :  { %969 = vmatpush3.bf16.msra.mxu0 %v1011_v6 }
  0x39   :  { %970 = vmatprep.subr.bf16.mxu0 %v1197_v2 }
  0x3c   :  { %971 = vmatpush3.bf16.msra.mxu0 %v1012_v7 }
  0x3d   :  { %972 = vmatprep.subr.bf16.mxu0 %v1197_v2 }
  0x40   :  { %973 = vmatpush3.bf16.msra.mxu0 %v1013_v8 }
  0x41   :  { %974 = vmatprep.subr.bf16.mxu0 %v1197_v2 }
  0x44   :  { %975 = vmatpush3.bf16.msra.mxu0 %v1014_v9 }
  0x45   :  { %976 = vmatprep.subr.bf16.mxu0 %v1197_v2 }
  0x48   :  { %977 = vmatpush3.bf16.msra.mxu0 %v1015_v10 }
  0x4b   :  { %979 = vmatmul.mubr.bf16.vlgmr.msra.gmra.mrb[0].mxu0 %v77_v13 }
 0x11e   :  { %v183_v19 = vpop.f32.mrb[0].mxu0 }
 0x11f   :  { %v1331_v20 = vadd.f32 %v888_v18, %v183_v19  ;;  %v980_v21 = vpop.f32.mrb[1].mxu0 }
 0x120   :  { %v186_v22 = vpop.f32.mrb[2].mxu0 }
 0x121   :  { %v190_v23 = vmax.f32 %v1331_v20, 0.0  ;;  %v1334_v24 = vadd.f32 %v888_v18, %v186_v22  ;;  %v981_v25 = vpop.f32.mrb[3].mxu0 }
 0x123   :  { %v191_v26 = vmax.f32 %v1334_v24, 0.0 }
 0x124 LB: > { %s897_s2 = sld [smem:[#allocation2 + $0x1]]  ;;  %s1188_s0 = sphi %s1337_s0, %s202_s0  }
 0x12a   : > { %p898_p2 = scmp.ne.s32.totalorder %s897_s2, 0 }
 0x12b   : > { %v1018_v27 = vld [vmem:[#allocation6 + $0x4] ss:$8 sps:$4 sm:$0xff] (!%p898_p2)   ;;  %v1020_v28 = vld [vmem:[#allocation6] ss:$8 sps:$4 sm:$0xff] (!%p898_p2)   ;;  %v1199_v29 = vmov (!%p898_p2), 0   ;;  %s208_s21 = sld [smem:[#allocation2]] (!%p898_p2) }
 0x12c   : > { %207 = sbr.rel (%p898_p2) target bundleno = 1783 (0x6f7), region = 60  ;;  %359 = vmatprep.mubr.bf16.mxu0 (!%p898_p2), %v1199_v29  ;;  %1016 = vset.pattern.permute.xlu1 (!%p898_p2), %v1199_v29  ;;  %v1021_v30 = vld [vmem:[#allocation6 + $0x14] ss:$8 sps:$4 sm:$0xff] (!%p898_p2)   ;;  %v1023_v31 = vld [vmem:[#allocation6 + $0x10] ss:$8 sps:$4 sm:$0xff] (!%p898_p2)   ;;  %v1353_v21 = vsub.s32 (!%p898_p2), 0, %v1321_v15 }
 0x12d   : > { %327 = vmatprep.subr.bf16.mxu0 (!%p898_p2), %v1018_v27  ;;  %1017 = vset.pattern.permute.xlu0 (!%p898_p2), %v1199_v29  ;;  %v1024_v32 = vld [vmem:[#allocation6 + $0x24] ss:$8 sps:$4 sm:$0xff] (!%p898_p2)   ;;  %v1026_v33 = vld [vmem:[#allocation6 + $0x20] ss:$8 sps:$4 sm:$0xff] (!%p898_p2)   ;;  %v1027_v34 = vld [vmem:[#allocation6 + $0x34] ss:$8 sps:$4 sm:$0xff] (!%p898_p2)  }
 0x12e   : > { %328 = vmatpush1.bf16.msra.mxu0 (!%p898_p2), %v1020_v28  ;;  %v1029_v35 = vld [vmem:[#allocation6 + $0x30] ss:$8 sps:$4 sm:$0xff] (!%p898_p2)   ;;  %v1030_v36 = vld [vmem:[#allocation6 + $0x44] ss:$8 sps:$4 sm:$0xff] (!%p898_p2)   ;;  %v1044_v38 = vld [vmem:[#allocation9] ss:$8 sps:$4 sm:$0xff] (!%p898_p2)  }
 0x12f   : > { %329 = vmatprep.subr.bf16.mxu0 (!%p898_p2), %v1021_v30  ;;  %v1042_v37 = vld [vmem:[#allocation9 + $0x4] ss:$8 sps:$4 sm:$0xff] (!%p898_p2)   ;;  %v1045_v39 = vld [vmem:[#allocation9 + $0x14] ss:$8 sps:$4 sm:$0xff] (!%p898_p2)   ;;  %v1032_v40 = vld [vmem:[#allocation6 + $0x40] ss:$8 sps:$4 sm:$0xff] (!%p898_p2)  }
 0x130   : > { %712 = vmatprep.subr.bf16.mxu1 (!%p898_p2), %v1042_v37  ;;  %v1047_v41 = vld [vmem:[#allocation9 + $0x10] ss:$8 sps:$4 sm:$0xff] (!%p898_p2)   ;;  %v1048_v42 = vld [vmem:[#allocation9 + $0x24] ss:$8 sps:$4 sm:$0xff] (!%p898_p2)   ;;  %v1033_v43 = vld [vmem:[#allocation6 + $0x54] ss:$8 sps:$4 sm:$0xff] (!%p898_p2)  }
 0x131   : > { %713 = vmatpush1.bf16.msra.mxu1 (!%p898_p2), %v1044_v38  ;;  %v1035_v44 = vld [vmem:[#allocation6 + $0x50] ss:$8 sps:$4 sm:$0xff] (!%p898_p2)   ;;  %s210_s23 = scalar_lea.vmem (!%p898_p2), %s1427_s3, %s208_s21  ;;  %v1050_v45 = vld [vmem:[#allocation9 + $0x20] ss:$8 sps:$4 sm:$0xff] (!%p898_p2)   ;;  %v1051_v46 = vld [vmem:[#allocation9 + $0x34] ss:$8 sps:$4 sm:$0xff] (!%p898_p2)  }
 0x132   : > { %330 = vmatpush1.bf16.msra.mxu0 (!%p898_p2), %v1023_v31  ;;  %714 = vmatprep.subr.bf16.mxu1 (!%p898_p2), %v1045_v39  ;;  %v1036_v47 = vld [vmem:[#allocation6 + $0x64] ss:$8 sps:$4 sm:$0xff] (!%p898_p2)   ;;  %v1038_v48 = vld [vmem:[#allocation6 + $0x60] ss:$8 sps:$4 sm:$0xff] (!%p898_p2)   ;;  %v899_v49 = vld [vmem:[%s210_s23] ss:$0 sm:$0xff] (!%p898_p2) }
 0x133   : > { %331 = vmatprep.subr.bf16.mxu0 %v1024_v32  ;;  %v1039_v50 = vld [vmem:[#allocation6 + $0x74] ss:$8 sps:$4 sm:$0xff]   ;;  %v1053_v51 = vld [vmem:[#allocation9 + $0x30] ss:$8 sps:$4 sm:$0xff]   ;;  %v1054_v52 = vld [vmem:[#allocation9 + $0x44] ss:$8 sps:$4 sm:$0xff]   ;;  %v216_v55 = vadd.f32 %v899_v49, %v190_v23  ;;  %v217_v56 = vadd.f32 %v899_v49, %v191_v26 }
 0x134   : > { %v1056_v53 = vld [vmem:[#allocation9 + $0x40] ss:$8 sps:$4 sm:$0xff]   ;;  %v1041_v54 = vld [vmem:[#allocation6 + $0x70] ss:$8 sps:$4 sm:$0xff]   ;;  %v1057_v57 = vld [vmem:[#allocation9 + $0x54] ss:$8 sps:$4 sm:$0xff]  }
 0x135   : > { %715 = vmatpush1.bf16.msra.mxu1 %v1047_v41  ;;  %v218_v58 = vpack.c.bf16 %v217_v56, %v216_v55  ;;  %v1059_v59 = vld [vmem:[#allocation9 + $0x50] ss:$8 sps:$4 sm:$0xff]   ;;  %v1060_v60 = vld [vmem:[#allocation9 + $0x64] ss:$8 sps:$4 sm:$0xff]   ;;  %v1062_v61 = vld [vmem:[#allocation9 + $0x60] ss:$8 sps:$4 sm:$0xff]  }
 0x136   : > { %332 = vmatpush1.bf16.msra.mxu0 %v1026_v33  ;;  %716 = vmatprep.subr.bf16.mxu1 %v1048_v42  ;;  %v1063_v62 = vld [vmem:[#allocation9 + $0x74] ss:$8 sps:$4 sm:$0xff]   ;;  %v1065_v63 = vld [vmem:[#allocation9 + $0x70] ss:$8 sps:$4 sm:$0xff]   ;;  %v1066_v0 = vld [vmem:[#allocation9 + $0x84] ss:$8 sps:$4 sm:$0xff]  }
 0x137   : > { %333 = vmatprep.subr.bf16.mxu0 %v1027_v34  ;;  %v1068_v1 = vld [vmem:[#allocation9 + $0x80] ss:$8 sps:$4 sm:$0xff]   ;;  %v1069_v2 = vld [vmem:[#allocation9 + $0x94] ss:$8 sps:$4 sm:$0xff]   ;;  %v1071_v3 = vld [vmem:[#allocation9 + $0x90] ss:$8 sps:$4 sm:$0xff]  }
 0x138   : > { %v1072_v4 = vld [vmem:[#allocation9 + $0xa4] ss:$8 sps:$4 sm:$0xff]   ;;  %v1074_v5 = vld [vmem:[#allocation9 + $0xa0] ss:$8 sps:$4 sm:$0xff]   ;;  %v1075_v6 = vld [vmem:[#allocation9 + $0xb4] ss:$8 sps:$4 sm:$0xff]  }
 0x139   : > { %717 = vmatpush1.bf16.msra.mxu1 %v1050_v45  ;;  %v1077_v7 = vld [vmem:[#allocation9 + $0xb0] ss:$8 sps:$4 sm:$0xff]   ;;  %v1078_v8 = vld [vmem:[#allocation9 + $0xc4] ss:$8 sps:$4 sm:$0xff]   ;;  %v1080_v9 = vld [vmem:[#allocation9 + $0xc0] ss:$8 sps:$4 sm:$0xff]  }
 0x13a   : > { %334 = vmatpush1.bf16.msra.mxu0 %v1029_v35  ;;  %718 = vmatprep.subr.bf16.mxu1 %v1051_v46  ;;  %v1081_v10 = vld [vmem:[#allocation9 + $0xd4] ss:$8 sps:$4 sm:$0xff]   ;;  %v1083_v11 = vld [vmem:[#allocation9 + $0xd0] ss:$8 sps:$4 sm:$0xff]   ;;  %v1084_v12 = vld [vmem:[#allocation9 + $0xe4] ss:$8 sps:$4 sm:$0xff]  }
 0x13b   : > { %335 = vmatprep.subr.bf16.mxu0 %v1030_v36  ;;  %v1086_v13 = vld [vmem:[#allocation9 + $0xe0] ss:$8 sps:$4 sm:$0xff]   ;;  %v1087_v14 = vld [vmem:[#allocation9 + $0xf4] ss:$8 sps:$4 sm:$0xff]   ;;  %v1089_v18 = vld [vmem:[#allocation9 + $0xf0] ss:$8 sps:$4 sm:$0xff]  }
 0x13c   : > { %v451_v19 = vld [vmem:[#allocation5] sm:$0x1]  ;;  %v235_v22 = vld [vmem:[%s1429_s5] sm:$0x3]  ;;  %v243_v25 = vsub.s32 1, %v1321_v15  ;;  %vm378_vm2 = vcmp.lt.s32.totalorder %v1321_v15, 1 }
 0x13d   : > { %719 = vmatpush1.bf16.msra.mxu1 %v1053_v51  ;;  %982 = vpush %v451_v19  ;;  %v240_v27 = vrot.slane %v235_v22, %v1353_v21  ;;  %vm396_vm3 = vcmp.lt.s32.totalorder %v1321_v15, 2  ;;  %vm414_vm4 = vcmp.lt.s32.totalorder %v1321_v15, 4  ;;  %vm484_vm9 = vcmask 7168   ;;  %s852_s12 = scalar_lea.vmem [#allocation11], %s1188_s0 }
 0x13e   : > { %336 = vmatpush1.bf16.msra.mxu0 %v1032_v40  ;;  %720 = vmatprep.subr.bf16.mxu1 %v1054_v52  ;;  %v244_v28 = vrot.slane %v235_v22, %v243_v25  ;;  %vm818_vm1 = vcmp.eq.s32.totalorder %v1326_v17, 1 }
 0x13f   : > { %337 = vmatprep.subr.bf16.mxu0 %v1033_v43 }
 0x141   : > { %721 = vmatpush1.bf16.msra.mxu1 %v1056_v53 }
 0x142   : > { %338 = vmatpush1.bf16.msra.mxu0 %v1035_v44  ;;  %722 = vmatprep.subr.bf16.mxu1 %v1057_v57 }
 0x143   : > { %339 = vmatprep.subr.bf16.mxu0 %v1036_v47 }
 0x145   : > { %723 = vmatpush1.bf16.msra.mxu1 %v1059_v59 }
 0x146   : > { %340 = vmatpush1.bf16.msra.mxu0 %v1038_v48  ;;  %724 = vmatprep.subr.bf16.mxu1 %v1060_v60 }
 0x147   : > { %341 = vmatprep.subr.bf16.mxu0 %v1039_v50 }
 0x149   : > { %725 = vmatpush1.bf16.msra.mxu1 %v1062_v61 }
 0x14a   : > { %342 = vmatpush1.bf16.msra.mxu0 %v1041_v54  ;;  %726 = vmatprep.subr.bf16.mxu1 %v1063_v62 }
 0x14d   : > { %360 = vmatmul.mubr.bf16.vlgmr.msra.gmra.mrb[0].mxu0 %v218_v58  ;;  %727 = vmatpush1.bf16.msra.mxu1 %v1065_v63 }
 0x14e   : > { %728 = vmatprep.subr.bf16.mxu1 %v1066_v0 }
 0x151   : > { %729 = vmatpush1.bf16.msra.mxu1 %v1068_v1 }
 0x152   : > { %730 = vmatprep.subr.bf16.mxu1 %v1069_v2 }
 0x155   : > { %731 = vmatpush1.bf16.msra.mxu1 %v1071_v3 }
 0x156   : > { %732 = vmatprep.subr.bf16.mxu1 %v1072_v4 }
 0x159   : > { %733 = vmatpush1.bf16.msra.mxu1 %v1074_v5 }
 0x15a   : > { %734 = vmatprep.subr.bf16.mxu1 %v1075_v6 }
 0x15d   : > { %735 = vmatpush1.bf16.msra.mxu1 %v1077_v7 }
 0x15e   : > { %736 = vmatprep.subr.bf16.mxu1 %v1078_v8 }
 0x161   : > { %737 = vmatpush1.bf16.msra.mxu1 %v1080_v9 }
 0x162   : > { %738 = vmatprep.subr.bf16.mxu1 %v1081_v10 }
 0x165   : > { %739 = vmatpush1.bf16.msra.mxu1 %v1083_v11 }
 0x166   : > { %740 = vmatprep.subr.bf16.mxu1 %v1084_v12 }
 0x169   : > { %741 = vmatpush1.bf16.msra.mxu1 %v1086_v13  ;;  %v916_v13 = vld [vmem:[%s1432_s8] ss:$0 sm:$0xff] }
 0x16a   : > { %742 = vmatprep.subr.bf16.mxu1 %v1087_v14 }
 0x16d   : > { %743 = vmatpush1.bf16.msra.mxu1 %v1089_v18 }
 0x16e   : > { %s983_s29 = spop %982 }
 0x220   : > { %v361_v30 = vpop.f32.mrb[0].mxu0 }
 0x221   : > { %v362_v31 = vadd.f32 %v361_v30, %v240_v27  ;;  %v363_v32 = vpop.f32.mrb[1].mxu0 }
 0x222   : > { %v364_v33 = vadd.f32 %v363_v32, %v244_v28  ;;  %v365_v34 = vpop.f32.mrb[2].mxu0 }
 0x223   : > { %v370_v35 = vmax.f32 %v362_v31, 0.0  ;;  %v366_v36 = vadd.f32 %v365_v34, %v240_v27  ;;  %v367_v37 = vpop.f32.mrb[3].mxu0 }
 0x224   : > { %v371_v38 = vmax.f32 %v364_v33, 0.0  ;;  %v368_v39 = vadd.f32 %v367_v37, %v244_v28  ;;  %v453_v37 = vstv %s983_s29 }
 0x225   : > { %v372_v40 = vmax.f32 %v366_v36, 0.0  ;;  %v374_v42 = vrot.slane %v370_v35, 7 }
 0x226   : > { %v373_v41 = vmax.f32 %v368_v39, 0.0  ;;  %v375_v44 = vrot.slane %v371_v38, 7 }
 0x227   : > { %v376_v43 = vrot.slane %v372_v40, 7 }
 0x228   : > { %v377_v45 = vrot.slane %v373_v41, 7 }
 0x229   : > { %v379_v46 = vsel %vm378_vm2, %v374_v42, %v376_v43  ;;  %v381_v47 = vsel %vm378_vm2, %v376_v43, %v374_v42 }
 0x22a   : > { %v384_v48 = vsel %vm378_vm2, -inf, %v381_v47  ;;  %v390_v49 = vmax.f32 %v372_v40, %v379_v46  ;;  %v380_v50 = vsel %vm378_vm2, %v375_v44, %v377_v45  ;;  %v382_v51 = vsel %vm378_vm2, %v377_v45, %v375_v44  ;;  %v209_v47 = vld [vmem:[#allocation3] sm:$0x1] }
 0x22b   : > { %v388_v52 = vmax.f32 %v370_v35, %v384_v48  ;;  %v385_v53 = vsel %vm378_vm2, -inf, %v382_v51  ;;  %v391_v54 = vmax.f32 %v373_v41, %v380_v50  ;;  %v473_v50 = vrot.slane %v209_v47, %v1353_v21 }
 0x22c   : > { %v394_v55 = vrot.slane %v390_v49, 6  ;;  %v389_v56 = vmax.f32 %v371_v38, %v385_v53  ;;  %v469_v51 = vadd.s32 1, %v1324_v16  ;;  %vm819_vm2 = vcmp.eq.s32.totalorder %v1326_v17, 3 }
 0x22d   : > { %v392_v57 = vrot.slane %v388_v52, 6  ;;  %v395_v58 = vrot.slane %v391_v54, 6 }
 0x22e   : > { %v393_v59 = vrot.slane %v389_v56, 6  ;;  %vm475_vm8 = vcmp.ge.s32.totalorder %v469_v51, %v473_v50 }
 0x22f   : > { %v397_v60 = vsel %vm396_vm3, %v392_v57, %v394_v55  ;;  %v399_v61 = vsel %vm396_vm3, %v394_v55, %v392_v57 }
 0x230   : > { %v408_v62 = vmax.f32 %v390_v49, %v397_v60  ;;  %v398_v63 = vsel %vm396_vm3, %v393_v59, %v395_v58  ;;  %v402_v0 = vsel %vm396_vm3, -inf, %v399_v61  ;;  %v400_v1 = vsel %vm396_vm3, %v395_v58, %v393_v59 }
 0x231   : > { %v409_v2 = vmax.f32 %v391_v54, %v398_v63  ;;  %v406_v3 = vmax.f32 %v388_v52, %v402_v0  ;;  %v403_v4 = vsel %vm396_vm3, -inf, %v400_v1  ;;  %v468_v49 = vadd.s32 1, %v1321_v15  ;;  %vm820_vm3 = vmor %vm818_vm1, %vm819_vm2 }
 0x232   : > { %v412_v5 = vrot.slane %v408_v62, 4  ;;  %v407_v6 = vmax.f32 %v389_v56, %v403_v4  ;;  %v481_v54 = vcvt.s32.f32 %v469_v51 }
 0x233   : > { %v413_v7 = vrot.slane %v409_v2, 4  ;;  %v410_v8 = vrot.slane %v406_v3, 4  ;;  %vm474_vm5 = vcmp.ge.s32.totalorder %v468_v49, %v473_v50  ;;  %v480_v53 = vcvt.s32.f32 %v468_v49 }
 0x234   : > { %v411_v9 = vrot.slane %v407_v6, 4 }
 0x235   : > { %v417_v10 = vsel %vm414_vm4, %v412_v5, %v410_v8  ;;  %v415_v11 = vsel %vm414_vm4, %v410_v8, %v412_v5  ;;  %v498_v8 = vcvt.s32.f32 %v1321_v15 }
 0x236   : > { %v420_v12 = vsel %vm414_vm4, -inf, %v417_v10  ;;  %v416_v14 = vsel %vm414_vm4, %v411_v9, %v413_v7  ;;  %v418_v18 = vsel %vm414_vm4, %v413_v7, %v411_v9  ;;  %v426_v19 = vmax.f32 %v408_v62, %v415_v11 }
 0x237   : > { %v424_v22 = vmax.f32 %v406_v3, %v420_v12  ;;  %v421_v27 = vsel %vm414_vm4, -inf, %v418_v18  ;;  %v427_v28 = vmax.f32 %v409_v2, %v416_v14  ;;  %v494_v2 = vcvt.s32.f32 %v209_v47 }
 0x238   : > { %v425_v30 = vmax.f32 %v407_v6, %v421_v27  ;;  %v499_v11 = vcvt.s32.f32 %v1324_v16  ;;  %v540_v27 = vld [vmem:[%s1431_s7] sm:$0x3] }
 0x239   : > { %v445_v31 = vmul.f32 %v916_v13, %v424_v22  ;;  %v436_v32 = vmax.f32 %v426_v19, %v424_v22 }
 0x23a   : > { %v437_v33 = vmax.f32 %v427_v28, %v425_v30  ;;  %v545_v28 = vrot.slane %v540_v27, %v1353_v21 }
 0x23b   : > { %447 = vadd.xlane.f32.xlu0 %v445_v31  ;;  %v506_v34 = vpack.c.bf16 %v436_v32, %v424_v22  ;;  %v446_v36 = vmul.f32 %v916_v13, %v436_v32 }
 0x23c   : > { %v507_v35 = vpack.c.bf16 %v437_v33, %v425_v30  ;;  %v549_v30 = vrot.slane %v540_v27, %v243_v25 }
 0x23e   : > { %744 = vmatprep.mubr.bf16.mxu1 %v507_v35 }
 0x23f   : > { %745 = vmatmul.mubr.bf16.vlgmr.msra.gmra.mrb[0].mxu1 %v506_v34  ;;  %449 = vadd.xlane.f32.xlu0 %v446_v36 }
 0x2c8   : > { %v448_v38 = vpop.xlane.xlu0 %447 }
 0x2c9   : > { %v454_v39 = vadd.f32 %v453_v37, %v448_v38 }
 0x2cb   : > { %v917_v40 = vmul.f32 -1.442695, %v454_v39 }
 0x2cc   : > { %v450_v41 = vpop.xlane.xlu0 %449 }
 0x2cd   : > { %1090 = vpow2.f32 %v917_v40  ;;  %v455_v42 = vadd.f32 %v453_v37, %v450_v41 }
 0x2cf   : > { %v918_v43 = vmul.f32 -1.442695, %v455_v42 }
 0x2d1   : > { %1092 = vpow2.f32 %v918_v43 }
 0x2d7   : > { %v1091_v44 = vpop.eup %1090 }
 0x2d8   : > { %v462_v45 = vadd.f32 1.0, %v1091_v44 }
 0x2da   : > { %1094 = vrcp.f32 %v462_v45 }
 0x2db   : > { %v1093_v46 = vpop.eup %1092 }
 0x2dc   : > { %v463_v48 = vadd.f32 1.0, %v1093_v46 }
 0x2de   : > { %1096 = vrcp.f32 %v463_v48 }
 0x2e4   : > { %v1095_v52 = vpop.eup %1094 }
 0x2e5   : > { %vm476_vm6 = vcmp.gt.f32.partialorder %v1095_v52, 0.5 }
 0x2e6   : > { %vm478_vm7 = vmand %vm474_vm5, %vm476_vm6 }
 0x2e7   : > { %v482_v56 = vsel %vm478_vm7, %v480_v53, 17.0  ;;  %vm842_vm7 = vcmp.eq.s32.totalorder %v1326_v17, 2 }
 0x2e8   : > { %v1097_v55 = vpop.eup %1096  ;;  %v485_v58 = vsel %vm484_vm9, %v482_v56, inf }
 0x2e9   : > { %vm477_vm10 = vcmp.gt.f32.partialorder %v1097_v55, 0.5 }
 0x2ea   : > { %vm479_vm11 = vmand %vm475_vm8, %vm477_vm10  ;;  %vm840_vm8 = vcmp.eq.s32.totalorder %v1326_v17, 0 }
 0x2eb   : > { %v483_v57 = vsel %vm479_vm11, %v481_v54, 17.0 }
 0x2ec   : > { %v486_v59 = vsel %vm484_vm9, %v483_v57, inf }
 0x2ed   : > { %v487_v60 = vmin.f32 %v485_v58, %v486_v59 }
 0x2ef   : > { %v488_v61 = vrot.slane %v487_v60, 4 }
 0x2f1   : > { %v489_v62 = vmin.f32 %v487_v60, %v488_v61 }
 0x2f3   : > { %v490_v63 = vrot.slane %v489_v62, 2 }
 0x2f5   : > { %v491_v0 = vmin.f32 %v489_v62, %v490_v63 }
 0x2f7   : > { %v492_v1 = vrot.slane %v491_v0, 1 }
 0x2f9   : > { %v493_v3 = vmin.f32 %v491_v0, %v492_v1 }
 0x2fb   : > { %v1371_v4 = vmax.f32 %v493_v3, %v494_v2 }
 0x2fd   : > { %v496_v5 = vmin.f32 %v1371_v4, 16.0  ;;  %v984_v6 = vtrunc.f32 %v1371_v4 }
 0x2ff   : > { %v919_v7 = vadd.f32 -1.0, %v496_v5  ;;  %v985_v9 = vcvt.f32.s32 %v984_v6 }
 0x301   : > { %v503_v10 = vrot.slane %v919_v7, %v1353_v21  ;;  %855 = vst.msk [vmem:[#allocation3] sm:$0x1] %vm73_vm0, %v985_v9 }
 0x303   : > { %vm504_vm12 = vcmp.eq.f32.partialorder %v498_v8, %v503_v10  ;;  %vm505_vm13 = vcmp.eq.f32.partialorder %v499_v11, %v503_v10 }
 0x304   : > { %v755_v12 = vsel %vm504_vm12, 1, %v1199_v29  ;;  %v756_v13 = vsel %vm505_vm13, 1, %v1199_v29 }
 0x305   : > { %758 = vperm.xlu1 %1016, %v755_v12  }
 0x309   : > { %761 = vperm.xlu1 %1016, %v756_v13  }
 0x312   : > { %v746_v14 = vpop.f32.mrb[0].mxu1 }
 0x313   : > { %v748_v18 = vpop.f32.mrb[1].mxu1  ;;  %v747_v32 = vadd.f32 %v746_v14, %v545_v28 }
 0x314   : > { %v750_v19 = vpop.f32.mrb[2].mxu1  ;;  %v749_v33 = vadd.f32 %v748_v18, %v549_v30 }
 0x315   : > { %v752_v22 = vpop.f32.mrb[3].mxu1  ;;  %v751_v34 = vadd.f32 %v750_v19, %v545_v28 }
 0x316   : > { %v753_v29 = vadd.f32 %v752_v22, %v549_v30 }
 0x384   : > { %v759_v31 = vpop.permute.xlu1 %758 }
 0x385   : > { %vm763_vm14 = vcmp.eq.s32.totalorder %v759_v31, 1 }
 0x386   : > { %v765_v36 = vsel %vm763_vm14, %v747_v32, 0.0  ;;  %v766_v37 = vsel %vm763_vm14, %v749_v33, 0.0 }
 0x388   : > { %v762_v35 = vpop.permute.xlu1 %761 }
 0x389   : > { %vm764_vm15 = vcmp.eq.s32.totalorder %v762_v35, 1 }
 0x38a   : > { %v767_v38 = vsel %vm764_vm15, %v751_v34, 0.0  ;;  %v768_v39 = vsel %vm764_vm15, %v753_v29, 0.0 }
 0x38b   : > { %v769_v40 = vadd.f32 %v767_v38, %v765_v36  ;;  %v776_v41 = vadd.f32 %v768_v39, %v766_v37 }
 0x38d   : > { %v770_v42 = vrot.slane %v769_v40, 4  ;;  %v777_v43 = vrot.slane %v776_v41, 4 }
 0x38f   : > { %v771_v21 = vadd.f32 %v770_v42, %v769_v40  ;;  %v778_v44 = vadd.f32 %v777_v43, %v776_v41  ;;  %v1200_v43 = vmov 0.0  }
 0x391   : > { %v772_v45 = vrot.slane %v771_v21, 2  ;;  %v779_v25 = vrot.slane %v778_v44, 2 }
 0x393   : > { %v780_v46 = vadd.f32 %v779_v25, %v778_v44  ;;  %v773_v47 = vadd.f32 %v772_v45, %v771_v21  ;;  %v843_v21 = vsel %vm819_vm2, 1.0, %v1200_v43 }
 0x395   : > { %v781_v48 = vrot.slane %v780_v46, 1  ;;  %v774_v49 = vrot.slane %v773_v47, 1 }
 0x397   : > { %v782_v50 = vadd.f32 %v781_v48, %v780_v46  ;;  %v775_v51 = vadd.f32 %v774_v49, %v773_v47 }
 0x399   : > { %794 = vmax.xlane.f32.xlu1 %v782_v50  ;;  %783 = vmax.xlane.f32.xlu0 %v775_v51 }
 0x426   : > { %v795_v52 = vpop.xlane.xlu1 %794  ;;  %v784_v53 = vpop.xlane.xlu0 %783 }
 0x427   : > { %v785_v54 = vsub.f32 %v775_v51, %v784_v53  ;;  %v796_v55 = vsub.f32 %v782_v50, %v795_v52 }
 0x429   : > { %v786_v56 = vmul.f32 1.442695, %v785_v54  ;;  %v797_v57 = vmul.f32 1.442695, %v796_v55 }
 0x42b   : > { %1098 = vpow2.f32 %v786_v56 }
 0x42c   : > { %1100 = vpow2.f32 %v797_v57 }
 0x435   : > { %v1099_v58 = vpop.eup %1098 }
 0x436   : > { %788 = vadd.xlane.f32.xlu0 %v1099_v58  ;;  %v1101_v59 = vpop.eup %1100 }
 0x43a   : > { %799 = vadd.xlane.f32.xlu0 %v1101_v59 }
 0x4c3   : > { %v789_v60 = vpop.xlane.xlu0 %788 }
 0x4c4   : > { %1102 = vlog2.f32 %v789_v60 }
 0x4c7   : > { %v800_v61 = vpop.xlane.xlu0 %799 }
 0x4c8   : > { %1104 = vlog2.f32 %v800_v61 }
 0x4ce   : > { %v1103_v62 = vpop.eup %1102 }
 0x4cf   : > { %v791_v63 = vmul.f32 0.6931472, %v1103_v62 }
 0x4d1   : > { %v792_v1 = vadd.f32 %v791_v63, %v784_v53 }
 0x4d2   : > { %v1105_v0 = vpop.eup %1104 }
 0x4d3   : > { %v802_v2 = vmul.f32 0.6931472, %v1105_v0  ;;  %v793_v6 = vsub.f32 %v775_v51, %v792_v1 }
 0x4d5   : > { %v803_v3 = vadd.f32 %v802_v2, %v795_v52 }
 0x4d7   : > { %v804_v7 = vsub.f32 %v782_v50, %v803_v3 }
 0x4d9   : > { %v806_v8 = vsub.f32 %v793_v6, %v804_v7  ;;  %v805_v18 = vmax.f32 %v793_v6, %v804_v7 }
 0x4db   : > { %v807_v9 = vand.u32 2147483647, %v806_v8 }
 0x4dd   : > { %v808_v10 = vsub.f32 0.0, %v807_v9 }
 0x4df   : > { %v809_v11 = vmul.f32 1.442695, %v808_v10 }
 0x4e1   : > { %1106 = vpow2.f32 %v809_v11 }
 0x4eb   : > { %v1107_v12 = vpop.eup %1106 }
 0x4ec   : > { %v811_v13 = vadd.f32 1.0, %v1107_v12 }
 0x4ee   : > { %1108 = vlog2.f32 %v811_v13 }
 0x4f8   : > { %v1109_v14 = vpop.eup %1108 }
 0x4f9   : > { %v813_v19 = vmul.f32 0.6931472, %v1109_v14 }
 0x4fb   : > { %v814_v22 = vadd.f32 %v813_v19, %v805_v18 }
 0x4fd   : > { %v952_v27 = vadd.f32 -0.6931472, %v814_v22 }
 0x4ff   : > { %vm816_vm4 = vcmp.ne.f32.partialorder %v952_v27, %v952_v27 }
 0x500   : > { %v817_v28 = vsel %vm816_vm4, -inf, %v952_v27 }
 0x501   : > { %v821_v30 = vsel %vm820_vm3, -inf, %v817_v28 }
 0x502   : > { %822 = vmax.xlane.f32.xlu0 %v821_v30 }
 0x58f   : > { %v823_v31 = vpop.xlane.xlu0 %822 }
 0x590   : > { %vm824_vm5 = vcmp.eq.f32.partialorder %v821_v30, %v823_v31 }
 0x591   : > { %v825_v32 = vsel %vm824_vm5, %v1326_v17, 128 }
 0x592   : > { %v827_v33 = vshra.s32 %v825_v32, 16  ;;  %v826_v29 = vand.u32 65535, %v825_v32 }
 0x594   : > { %v829_v34 = vcvt.s32.f32 %v827_v33  ;;  %v828_v36 = vcvt.s32.f32 %v826_v29 }
 0x596   : > { %830 = vmin.xlane.f32.xlu0 %v829_v34 }
 0x623   : > { %v831_v35 = vpop.xlane.xlu0 %830 }
 0x624   : > { %vm832_vm6 = vcmp.eq.f32.partialorder %v829_v34, %v831_v35  ;;  %v837_v38 = vcvt.f32.s32 %v831_v35 }
 0x625   : > { %v833_v37 = vsel %vm832_vm6, %v828_v36, inf }
 0x626   : > { %834 = vmin.xlane.f32.xlu0 %v833_v37  ;;  %v838_v40 = vshll.u32 %v837_v38, 16 }
 0x63c   : > { %846 = vperm.xlu0 %1017, %v496_v5  }
 0x6b3   : > { %v835_v39 = vpop.xlane.xlu0 %834 }
 0x6b4   : > { %v836_v41 = vcvt.f32.s32 %v835_v39 }
 0x6b6   : > { %v839_v42 = vadd.s32 %v838_v40, %v836_v41 }
 0x6b8   : > { %856 = vst.msk [vmem:[#allocation4] sm:$0x1] %vm73_vm0, %v839_v42  ;;  %v841_v45 = vcvt.s32.f32 %v839_v42 }
 0x6bb   : > { %v847_v44 = vpop.permute.xlu0 %846 }
 0x6bc   : > { %v849_v4 = vsel %vm842_vm7, %v847_v44, %v843_v21 }
 0x6bd   : > { %v850_v5 = vsel %vm818_vm1, %v823_v31, %v849_v4 }
 0x6be   : > { %v851_v25 = vsel %vm840_vm8, %v841_v45, %v850_v5 }
 0x6bf   : > { %853 = vst [vmem:[%s852_s12] sm:$0x1] %v851_v25  ;;  %v857_v46 = vld [vmem:[#allocation4] sm:$0x1] }
 0x6c0   : > { %986 = vpush %v857_v46 }
 0x6f1   : > { %s987_s13 = spop %986 }
 0x6f2   : > { %859 = sst [smem:[#allocation2]] %s987_s13  ;;  %p860_p3 = scmp.eq.s32.totalorder %s987_s13, 2 }
 0x6f4   : > { %s861_s14 = scalar_select %p860_p3, 1, 0 }
 0x6f6   : > { %862 = sst [smem:[#allocation2 + $0x1]] %s861_s14 }
 0x6f7 PF: > { %s202_s0 = sadd.s32 1, %s1188_s0  }
 0x6f8   : > { %p199_p4 = scmp.ge.s32.totalorder %s202_s0, 10  }
 0x6f9   :  { %s1201_s15 = smov (%p199_p4), [#allocation11]  }
 0x6fa   :  { %201 = sbr.rel (!%p199_p4) target bundleno = 292 (0x124), region = 83  ;;  %s868_s17 = sshll.u32 (%p199_p4), %s1201_s15, 4  ;;  %s869_s17 = int_to_ptr.vmem [resolvable:$true] %s868_s17 }
 0x6fb   :  { %s1154_s18 = scalar_lea.vmem (%p199_p4), %s869_s17, 256  ;;  %p1159_p6 = scmp.lt.s32.totalorder (%p199_p4), %s869_s17, %s869_s17 }
 0x6fc   :  { %p1155_p5 = scmp.ne.s32.totalorder (%p199_p4), %s869_s17, %s1154_s18  ;;  %p1160_p7 = scmp.lt.s32.totalorder (%p199_p4), %s1154_s18, %s1154_s18 }
 0x6fe   :  { %p1161_p8 = por (%p199_p4), %p1160_p7, %p1159_p6 }
 0x700   :  { %p1162_p9 = pnand (%p199_p4), %p1161_p8, %p1155_p5 }
 0x702   :  { %1165 = shalt.err (!%p1162_p9)
}
 0x703   :  { %s1166_s19 = scalar_lea.hbm %s1434_s10, 256 }
 0x704   :  { %p1167_p10 = scmp.ne.s32.totalorder %s1434_s10, %s1166_s19  ;;  %p1170_p11 = scmp.lt.u32.totalorder %s1166_s19, %s1434_s10 }
 0x706   :  { %p1172_p12 = pnand %p1170_p11, %p1167_p10 }
 0x708   :  { %1175 = shalt.err (!%p1172_p12)
}
 0x709   :  { %874 = dma.vmem_to_hbm [thread:$0]  %s869_s17, 256, %s1434_s10, [#allocation8], %s1191_s24, %s1191_s24, %s1192_s25  }
 0x70a   :  { %1184 = dma.done.wait [#allocation8], 256  }
 0x70b   :  { %1185 = vsyncadd [#allocation8], 4294967040 }
 0x70c   :  { %878 = vsyncpa [#allocation7], 1 }
 0x70d   :  { %879 = vsyncpa [#allocation10], 1 }
 0x70e   :  { %880 = vsyncpa [#allocation8], 1 }

</bundles_post_ra>
